<compile_context>
chip_gen: v7x
topology: tpu7x:2x2x1
jax: 0.10.0
libtpu: 0.0.40
codegen_flags: <defaults>
</compile_context>

<pallas_src>
import functools
import math

import jax
import jax.numpy as jnp
from jax.experimental import pallas as pl
from jax.experimental.pallas import tpu as pltpu


def _label_smoothing_kernel(x_ref, tgt_ref, loss_ref, acc_ref, *,
                            padding_idx, confidence, fill, clc, flf,
                            k_steps, total_tiles, skip_overhang):
    p = pl.program_id(0)
    k = pl.program_id(1)

    @pl.when(k == 0)
    def _():
        acc_ref[...] = jnp.zeros_like(acc_ref)

    def _accumulate():
        x = x_ref[...].astype(jnp.float32)      # (TN, V) log-probs
        tgt = tgt_ref[...]                      # (TN, 1) int32
        cols = jax.lax.broadcasted_iota(jnp.int32, x.shape, 1)

        is_tgt = cols == tgt
        # true_dist takes only two nonzero values -> select the coefficient and the
        # pre-folded td*log(td) constant, then a single multiply-subtract.
        coef = jnp.where(is_tgt, jnp.float32(confidence), jnp.float32(fill))
        const = jnp.where(is_tgt, jnp.float32(clc), jnp.float32(flf))
        contrib = const - coef * x
        # Rows whose target is the padding index contribute 0.  Keep this a SELECT
        # (not a multiply-by-zero) so NaN/garbage in an over-read tail x block
        # (x is never padded on the host) cannot propagate into the accumulator.
        contrib = jnp.where(tgt == padding_idx, jnp.float32(0.0), contrib)

        tn, v = contrib.shape
        # Leading-axis-split reshape is layout-compatible (sublane grouping only),
        # so this lowers to plain VPU adds; the cross-lane reduce is deferred to
        # the epilogue.
        acc_ref[...] += jnp.sum(contrib.reshape(tn // 8, 8, v), axis=0)

    if skip_overhang:
        # Grid tiles beyond the real row range (P-rounding) are clamped duplicates:
        # skip their accumulation entirely.
        pl.when(p * k_steps + k < total_tiles)(_accumulate)
    else:
        _accumulate()

    @pl.when(k == k_steps - 1)
    def _():
        acc = acc_ref[...]
        cols = jax.lax.broadcasted_iota(jnp.int32, acc.shape, 1)
        # true_dist[:, padding_idx] = 0  -> drop that column once here instead of
        # masking it per element in the hot loop.
        acc = jnp.where(cols == padding_idx, jnp.float32(0.0), acc)
        loss_ref[0, 0] = jnp.sum(acc)


def _vmem_capacity_bytes():
    """Physical per-TensorCore VMEM; conservative 64 MiB fallback (v7x-safe)."""
    try:
        return int(pltpu.get_tpu_info().vmem_capacity_bytes)
    except Exception:
        return 64 << 20


def _choose_tile_n(n, v, itemsize, vmem_cap):
    """Row tile sized so 2 double-buffered input blocks + (8,V) acc fit in ~75% VMEM."""
    row_q = 8 if itemsize >= 4 else 16
    bytes_per_row = v * itemsize + 128 * 4          # x row + lane-padded (TN,1) target row
    acc_bytes = 8 * v * 4
    pref_block = min(16 << 20, max(4 << 20, vmem_cap // 8))
    budget = max(1 << 20, (vmem_cap * 3) // 4 - acc_bytes - (2 << 20))
    block = min(pref_block, budget // 2)
    t = block // bytes_per_row
    t = max(row_q, (t // row_q) * row_q)
    t = min(t, 2048)
    n_q = -(-n // row_q) * row_q
    return max(row_q, min(t, n_q))


def label_smoothing_loss(x, target, *, size, padding_idx, smoothing,
                         tile_n=None, num_cores=1):
    """x: (N, size) float log-probs, target: (N,) int. Returns scalar f32 loss.

    num_cores=1 for single-TensorCore parts (v5e/v6e); pass num_cores=2 on v7x to
    shard row-chunks across both TensorCores (CORE_PARALLEL axis).
    """
    N, V = x.shape
    assert V == size, f"x.shape[1]={V} must equal size={size}"

    confidence = 1.0 - smoothing
    fill = smoothing / (size - 2)
    # td * log(td) folded at trace time; 0 * log(0) := 0 as in KLDivLoss.
    clc = confidence * math.log(confidence) if confidence > 0.0 else 0.0
    flf = fill * math.log(fill) if fill > 0.0 else 0.0

    itemsize = jnp.dtype(x.dtype).itemsize
    row_q = 8 if itemsize >= 4 else 16
    vmem_cap = _vmem_capacity_bytes()
    if tile_n is None:
        tile_n = _choose_tile_n(N, V, itemsize, vmem_cap)
    assert tile_n % row_q == 0, f"tile_n must be a multiple of {row_q}"

    total_tiles = -(-N // tile_n)                            # real row tiles T
    p_chunks = num_cores if (num_cores > 1 and total_tiles >= num_cores) else 1
    k_steps = -(-total_tiles // p_chunks)
    grid_tiles = p_chunks * k_steps
    skip_overhang = grid_tiles > total_tiles

    # Only the (cheap) target column gets padded; x stays untouched in HBM.
    covered_rows = total_tiles * tile_n
    tgt2 = target.reshape(N, 1).astype(jnp.int32)
    if covered_rows != N:
        tgt2 = jnp.pad(tgt2, ((0, covered_rows - N), (0, 0)),
                       constant_values=padding_idx)

    def row_map(p, k):
        idx = p * k_steps + k
        if skip_overhang:
            # Overhang grid tiles (from P-rounding) are clamped to the last real
            # tile and skipped inside the kernel, so no block is ever fully OOB.
            idx = jnp.minimum(idx, total_tiles - 1)
        return (idx, 0)

    kernel = functools.partial(
        _label_smoothing_kernel,
        padding_idx=padding_idx, confidence=confidence, fill=fill,
        clc=clc, flf=flf, k_steps=k_steps, total_tiles=total_tiles,
        skip_overhang=skip_overhang)

    x_block_bytes = tile_n * V * itemsize
    tgt_block_bytes = tile_n * 128 * 4          # (TN,1) lane-pads to 128 lanes in VMEM
    acc_bytes = 8 * V * 4
    needed = 2 * (x_block_bytes + tgt_block_bytes) + acc_bytes + (2 << 20)
    vmem_limit = int(min(max(needed, 16 << 20), (vmem_cap * 9) // 10))

    cost = pl.CostEstimate(
        flops=6 * N * V,
        transcendentals=0,
        bytes_accessed=N * V * itemsize + covered_rows * 4 + p_chunks * 4)

    if p_chunks > 1:
        dims = (pltpu.CORE_PARALLEL, pltpu.ARBITRARY)   # v7x: one row-chunk per TC
    else:
        dims = ("arbitrary", "arbitrary")

    partials = pl.pallas_call(
        kernel,
        out_shape=jax.ShapeDtypeStruct((p_chunks, 1), jnp.float32),
        grid=(p_chunks, k_steps),
        in_specs=[
            pl.BlockSpec((tile_n, V), row_map),     # x row slab (may over-read tail)
            pl.BlockSpec((tile_n, 1), row_map),     # targets (padded column)
        ],
        out_specs=pl.BlockSpec((1, 1), lambda p, k: (p, 0),
                               memory_space=pltpu.SMEM),
        scratch_shapes=[pltpu.VMEM((8, V), jnp.float32)],
        compiler_params=pltpu.CompilerParams(
            dimension_semantics=dims,
            vmem_limit_bytes=vmem_limit),
        cost_estimate=cost,
    )(x, tgt2)

    return jnp.sum(partials)


def _reference_loss(x, target, *, size, padding_idx, smoothing):
    """Pure-JAX reference mirroring the PyTorch module."""
    N, V = x.shape
    cols = jnp.arange(V)[None, :]
    tgt = target.reshape(N, 1)
    td = jnp.full((N, V), smoothing / (size - 2), dtype=jnp.float32)
    td = jnp.where(cols == tgt, 1.0 - smoothing, td)
    td = jnp.where(cols == padding_idx, 0.0, td)
    td = jnp.where(tgt == padding_idx, 0.0, td)
    contrib = jnp.where(td > 0.0, td * (jnp.log(td) - x.astype(jnp.float32)), 0.0)
    return jnp.sum(contrib)


if __name__ == "__main__":
    # Module "parameters": size (vocab), padding_idx, smoothing.
    size = 128
    padding_idx = 0
    smoothing = 0.1

    # N deliberately NOT a multiple of the tile so the no-pad / over-read path
    # (target-padded tail block) is exercised.
    N = 53

    key = jax.random.PRNGKey(0)
    k_logits, k_tgt = jax.random.split(key)

    logits = jax.random.normal(k_logits, (N, size), dtype=jnp.float32)
    x = jax.nn.log_softmax(logits, axis=-1)                       # log-probabilities

    target = jax.random.randint(k_tgt, (N,), 0, size, dtype=jnp.int32)
    # Force a few padding targets to exercise the row-masking path.
    target = target.at[3].set(padding_idx).at[10].set(padding_idx)

    # tile_n=16 at these toy shapes exercises the multi-step grid + partial last
    # block; at real shapes leave tile_n=None so it is auto-sized against VMEM.
    loss = label_smoothing_loss(x, target, size=size,
                                padding_idx=padding_idx, smoothing=smoothing,
                                tile_n=16)
    loss = jax.block_until_ready(loss)

    ref = _reference_loss(x, target, size=size,
                          padding_idx=padding_idx, smoothing=smoothing)
    assert jnp.allclose(loss, ref, rtol=1e-5, atol=1e-3), (loss, ref)

    # TODO(synk): module also stores self.true_dist (N,V); only the scalar loss is
    # materialized here since that is the forward return value.
    print("KERNEL_OK")
</pallas_src>

<mosaic_0001>
module attributes {stable_mosaic.version = 11 : i64} {
  func.func @_label_smoothing_kernel(%arg0: i32, %arg1: i32, %arg2: memref<16x128xf32, #tpu.memory_space<vmem>>, %arg3: memref<16x1xi32, #tpu.memory_space<vmem>>, %arg4: memref<1x1xf32, #tpu.memory_space<smem>>, %arg5: memref<8x128xf32, #tpu.memory_space<vmem>>) attributes {dimension_semantics = [#tpu.dimension_semantics<arbitrary>, #tpu.dimension_semantics<arbitrary>], iteration_bounds = array<i64: 1, 4>, scalar_prefetch = 0 : i64, scratch_operands = 1 : i64, tpu.core_type = #tpu.core_type<tc>, window_params = [{transform_indices = @transform_0, window_bounds = array<i64: 16, 128>}, {transform_indices = @transform_1, window_bounds = array<i64: 16, 1>}, {transform_indices = @transform_2, window_bounds = array<i64: 1, 1>}]} {
    %c0_i32 = arith.constant 0 : i32
    %0 = arith.cmpi eq, %arg1, %c0_i32 : i32
    %1 = arith.extui %0 : i1 to i32
    %c0_i32_0 = arith.constant 0 : i32
    %2 = arith.cmpi ne, %1, %c0_i32_0 : i32
    scf.if %2 {
      %cst_15 = arith.constant 0.000000e+00 : f32
      %30 = vector.broadcast %cst_15 : f32 to vector<8x128xf32>
      %c0_16 = arith.constant 0 : index
      %c0_17 = arith.constant 0 : index
      %31 = vector.load %arg5[%c0_16, %c0_17] : memref<8x128xf32, #tpu.memory_space<vmem>>, vector<8x128xf32>
      tpu.vector_store %arg5[%c0_16, %c0_17], %30 {strides = array<i32>} : memref<8x128xf32, #tpu.memory_space<vmem>>, vector<8x128xf32>,
    } else {
    }
    %c0 = arith.constant 0 : index
    %c0_1 = arith.constant 0 : index
    %3 = vector.load %arg2[%c0, %c0_1] : memref<16x128xf32, #tpu.memory_space<vmem>>, vector<16x128xf32>
    %c0_2 = arith.constant 0 : index
    %c0_3 = arith.constant 0 : index
    %4 = vector.load %arg3[%c0_2, %c0_3] : memref<16x1xi32, #tpu.memory_space<vmem>>, vector<16x1xi32>
    %5 = tpu.iota {dimensions = array<i32: 1>} : vector<16x128xi32>
    %6 = vector.broadcast %4 : vector<16x1xi32> to vector<16x128xi32>
    %7 = arith.cmpi eq, %5, %6 : vector<16x128xi32>
    %cst = arith.constant 0.899999976 : f32
    %cst_4 = arith.constant 7.93650805E-4 : f32
    %8 = vector.broadcast %cst : f32 to vector<16x128xf32>
    %9 = vector.broadcast %cst_4 : f32 to vector<16x128xf32>
    %10 = arith.select %7, %8, %9 : vector<16x128xi1>, vector<16x128xf32>
    %cst_5 = arith.constant -0.0948244631 : f32
    %cst_6 = arith.constant -0.00566576747 : f32
    %11 = vector.broadcast %cst_5 : f32 to vector<16x128xf32>
    %12 = vector.broadcast %cst_6 : f32 to vector<16x128xf32>
    %13 = arith.select %7, %11, %12 : vector<16x128xi1>, vector<16x128xf32>
    %14 = arith.mulf %10, %3 : vector<16x128xf32>
    %15 = arith.subf %13, %14 : vector<16x128xf32>
    %c0_i32_7 = arith.constant 0 : i32
    %16 = vector.broadcast %c0_i32_7 : i32 to vector<16x1xi32>
    %17 = arith.cmpi eq, %4, %16 : vector<16x1xi32>
    %cst_8 = arith.constant 0.000000e+00 : f32
    %18 = vector.shape_cast %17 : vector<16x1xi1> to vector<16x1xi1>
    %19 = vector.broadcast %18 : vector<16x1xi1> to vector<16x128xi1>
    %20 = vector.broadcast %cst_8 : f32 to vector<16x128xf32>
    %21 = arith.select %19, %20, %15 : vector<16x128xi1>, vector<16x128xf32>
    %c0_9 = arith.constant 0 : index
    %c0_10 = arith.constant 0 : index
    %22 = vector.load %arg5[%c0_9, %c0_10] : memref<8x128xf32, #tpu.memory_space<vmem>>, vector<8x128xf32>
    %23 = vector.shape_cast %21 : vector<16x128xf32> to vector<2x8x128xf32>
    %cst_11 = arith.constant dense<0.000000e+00> : vector<8x128xf32>
    %24 = vector.multi_reduction <add>, %23, %cst_11 [0] : vector<2x8x128xf32> to vector<8x128xf32>
    %25 = arith.addf %22, %24 : vector<8x128xf32>
    %c0_12 = arith.constant 0 : index
    %c0_13 = arith.constant 0 : index
    %26 = vector.load %arg5[%c0_12, %c0_13] : memref<8x128xf32, #tpu.memory_space<vmem>>, vector<8x128xf32>
    tpu.vector_store %arg5[%c0_12, %c0_13], %25 {strides = array<i32>} : memref<8x128xf32, #tpu.memory_space<vmem>>, vector<8x128xf32>,
    %c3_i32 = arith.constant 3 : i32
    %27 = arith.cmpi eq, %arg1, %c3_i32 : i32
    %28 = arith.extui %27 : i1 to i32
    %c0_i32_14 = arith.constant 0 : i32
    %29 = arith.cmpi ne, %28, %c0_i32_14 : i32
    scf.if %29 {
      %c0_15 = arith.constant 0 : index
      %c0_16 = arith.constant 0 : index
      %30 = vector.load %arg5[%c0_15, %c0_16] : memref<8x128xf32, #tpu.memory_space<vmem>>, vector<8x128xf32>
      %31 = tpu.iota {dimensions = array<i32: 1>} : vector<8x128xi32>
      %c0_i32_17 = arith.constant 0 : i32
      %32 = vector.broadcast %c0_i32_17 : i32 to vector<8x128xi32>
      %33 = arith.cmpi eq, %31, %32 : vector<8x128xi32>
      %cst_18 = arith.constant 0.000000e+00 : f32
      %34 = vector.broadcast %cst_18 : f32 to vector<8x128xf32>
      %35 = arith.select %33, %34, %30 : vector<8x128xi1>, vector<8x128xf32>
      %36 = vector.shape_cast %35 : vector<8x128xf32> to vector<1x8x128xf32>
      %cst_19 = arith.constant dense<0.000000e+00> : vector<1xf32>
      %37 = vector.multi_reduction <add>, %36, %cst_19 [1, 2] : vector<1x8x128xf32> to vector<1xf32>
      %38 = vector.shape_cast %37 : vector<1xf32> to vector<1x1x1xf32>
      %39 = vector.extract %38[0, 0, 0] : f32 from vector<1x1x1xf32>
      %c0_20 = arith.constant 0 : index
      %c0_21 = arith.constant 0 : index
      %40 = memref.load %arg4[%c0_20, %c0_21] : memref<1x1xf32, #tpu.memory_space<smem>>
      memref.store %39, %arg4[%c0_20, %c0_21] : memref<1x1xf32, #tpu.memory_space<smem>>
    } else {
    }
    return
  }
  func.func @transform_0(%arg0: i32, %arg1: i32) -> (i32, i32) {
    %c4_i32 = arith.constant 4 : i32
    %0 = arith.muli %arg0, %c4_i32 : i32
    %1 = arith.addi %0, %arg1 : i32
    %c0_i32 = arith.constant 0 : i32
    %c0_i32_0 = arith.constant 0 : i32
    return %1, %c0_i32 : i32, i32
  }
  func.func @transform_1(%arg0: i32, %arg1: i32) -> (i32, i32) {
    %c4_i32 = arith.constant 4 : i32
    %0 = arith.muli %arg0, %c4_i32 : i32
    %1 = arith.addi %0, %arg1 : i32
    %c0_i32 = arith.constant 0 : i32
    %c0_i32_0 = arith.constant 0 : i32
    return %1, %c0_i32 : i32, i32
  }
  func.func @transform_2(%arg0: i32, %arg1: i32) -> (i32, i32) {
    %c0_i32 = arith.constant 0 : i32
    %c0_i32_0 = arith.constant 0 : i32
    return %arg0, %c0_i32 : i32, i32
  }
}

</mosaic_0001>

<bundles_post_ra>
// kernel: tpu_custom_call.1
= control target key start
LH: loop header
LB: loop body
LE: loop exit
PB: predicated region body
PF: predicated region fallthrough
CT: control target
= control target key end

     0   :  { %7 = vsyncpa [#allocation4], 0  ;;  %s465_s9 = smov 0   ;;  %s467_s10 = smov 0   ;;  %s522_s0 = inlined_call_operand.vmem [shape: f32[53,128], index: 0, kind: input, shape index: {}]   ;;  %s523_s1 = inlined_call_operand.vmem [shape: s32[64,1], index: 1, kind: input, shape index: {}]   ;;  %s524_s2 = inlined_call_operand.hbm [shape: f32[1,1], index: 2, kind: output, shape index: {}]  }
   0x1   :  { %s469_s11 = smov 0  }
   0x2 LB: > { %s352_s12 = sadd.s32 4294967295, %s443_s11   ;;  %s22_s13 = sadd.s32 1, %s439_s10  ;;  %s443_s11 = sphi %s469_s11, %s13_s11   ;;  %s439_s10 = sphi %s467_s10, %s526_s10   ;;  %s435_s9 = sphi %s465_s9, %s525_s9  }
   0x3   : > { %p23_p0 = scmp.ge.s32.totalorder %s22_s13, 4  ;;  %p355_p1 = scmp.ge.s32.totalorder %s443_s11, 1 }
   0x4   : > { %p161_p2 = scmp.lt.s32.totalorder %s443_s11, 5 }
   0x5   : > { %s528_s13 = smov (%p23_p0, %s22_s13), 0 }
   0x6   : > { %p162_p3 = pnand %p355_p1, %p161_p2 }
   0x7   : > { %s356_s14 = sshll.u32 (!%p162_p3), %s435_s9, 1  ;;  %p360_p6 = scmp.ne.s32.totalorder (!%p162_p3), %s435_s9, 0 }
   0x8   : > { %165 = sbr.rel (%p162_p3) target bundleno = 397 (0x18d), region = 28  ;;  %p198_p4 = scmp.lt.s32.totalorder (!%p162_p3), %s356_s14, 6 }
   0x9   : > { %p212_p5 = scmp.lt.s32.totalorder (!%p162_p3), %s356_s14, 7 }
   0xf   : > { %s199_s15 = scalar_select %p198_p4, %s356_s14, 6 }
  0x10   : > { %s530_s14 = smov (!%p212_p5, %s356_s14), 7  ;;  %222 = sbr.rel (%p360_p6) target bundleno = 23 (0x17), region = 32 }
  0x11   : > { %s357_s16 = sshll.u32 %s199_s15, 3  ;;  %s359_s20 = sshll.u32 %s530_s14, 3  ;;  %v445_v0 = vmov (!%p360_p6), 0.0  }
  0x12   : > { %s490_s19 = scalar_lea.vmem %s522_s0, %s357_s16  ;;  %s215_s23 = scalar_lea.vmem %s523_s1, %s359_s20  ;;  %223 = vst [vmem:[#allocation2] sm:$0xff] (!%p360_p6), %v445_v0 }
  0x17 PF: > { %v226_v1 = vld [vmem:[%s215_s23] sm:$0xff]  ;;  %v227_v2 = vld [vmem:[%s215_s23 + $0x8] sm:$0xff]  ;;  %v446_v3 = vmov 0   ;;  %v228_v6 = vlaneseq  ;;  %v447_v11 = vmov 0.0007936508   ;;  %p361_p7 = scmp.ne.s32.totalorder %s435_s9, 3 }
  0x18   : > { %403 = vset.pattern.permute.xlu0 %v446_v3  ;;  %404 = vset.pattern.permute.xlu1 %v446_v3  ;;  %vm246_vm0 = vcmp.eq.s32.totalorder %v226_v1, 0  ;;  %vm247_vm1 = vcmp.eq.s32.totalorder %v227_v2, 0  ;;  %v224_v9 = vld [vmem:[%s490_s19] sm:$0xff]  ;;  %v225_v15 = vld [vmem:[%s490_s19 + $0x8] sm:$0xff]  ;;  %v448_v16 = vmov -0.0056657675  }
  0x19   : > { %231 = vperm.xlu0 %403, %v226_v1   ;;  %v248_v4 = vsel %vm246_vm0, 1, %v446_v3  ;;  %v249_v5 = vsel %vm247_vm1, 1, %v446_v3  ;;  %v229_v7 = vand.u32 127, %v228_v6  ;;  %v260_v25 = vld [vmem:[#allocation2] sm:$0xff] }
  0x1a   : > { %251 = vperm.xlu1 %404, %v248_v4  }
  0x1b   : > { %vm269_vm6 = vcmp.eq.s32.totalorder (!%p361_p7), %v229_v7, 0 }
  0x1d   : > { %234 = vperm.xlu0 %403, %v227_v2  }
  0x1e   : > { %254 = vperm.xlu1 %404, %v249_v5  }
  0x98   : > { %v232_v8 = vpop.permute.xlu0 %231 }
  0x99   : > { %vm236_vm2 = vcmp.eq.s32.totalorder %v229_v7, %v232_v8  ;;  %v252_v10 = vpop.permute.xlu1 %251 }
  0x9a   : > { %v238_v12 = vsel %vm236_vm2, 0.9, %v447_v11  ;;  %v240_v17 = vsel %vm236_vm2, -0.09482446, %v448_v16  ;;  %vm256_vm4 = vcmp.eq.s32.totalorder %v252_v10, 1 }
  0x9b   : > { %v242_v13 = vmul.f32 %v238_v12, %v224_v9 }
  0x9c   : > { %v235_v14 = vpop.permute.xlu0 %234 }
  0x9d   : > { %vm237_vm3 = vcmp.eq.s32.totalorder %v229_v7, %v235_v14  ;;  %v244_v19 = vsub.f32 %v240_v17, %v242_v13  ;;  %v255_v21 = vpop.permute.xlu1 %254 }
  0x9e   : > { %v239_v18 = vsel %vm237_vm3, 0.9, %v447_v11  ;;  %v241_v22 = vsel %vm237_vm3, -0.09482446, %v448_v16  ;;  %vm257_vm5 = vcmp.eq.s32.totalorder %v255_v21, 1 }
  0x9f   : > { %v243_v20 = vmul.f32 %v239_v18, %v225_v15  ;;  %v258_v24 = vsel %vm256_vm4, 0.0, %v244_v19 }
  0xa1   : > { %v245_v23 = vsub.f32 %v241_v22, %v243_v20 }
  0xa2   : > { %267 = sbr.rel (%p361_p7) target bundleno = 382 (0x17e), region = 36 }
  0xa3   : > { %v259_v26 = vsel %vm257_vm5, 0.0, %v245_v23 }
  0xa4   : > { %v261_v27 = vadd.f32 %v259_v26, %v258_v24 }
  0xa6   : > { %v262_v28 = vadd.f32 %v261_v27, %v260_v25 }
  0xa8   : > { %263 = vst [vmem:[#allocation2] sm:$0xff] %v262_v28 }
  0xaf   : > { %v268_v29 = vld [vmem:[#allocation2] sm:$0xff] }
  0xb0   : > { %v270_v30 = vsel %vm269_vm6, 0.0, %v268_v29 }
  0xb1   : > { %271 = vadd.xlane.f32.xlu0 %v270_v30 }
 0x13e   : > { %v272_v31 = vpop.xlane.xlu0 %271 }
 0x13f   : > { %v273_v32 = vrot.slane %v272_v31, 4 }
 0x141   : > { %v274_v33 = vadd.f32 %v273_v32, %v272_v31 }
 0x143   : > { %v275_v34 = vrot.slane %v274_v33, 2 }
 0x145   : > { %v276_v35 = vadd.f32 %v275_v34, %v274_v33 }
 0x147   : > { %v277_v36 = vrot.slane %v276_v35, 1 }
 0x149   : > { %v278_v37 = vadd.f32 %v277_v36, %v276_v35 }
 0x14b   : > { %366 = vpush %v278_v37 }
 0x17c   : > { %s367_s24 = spop %366 }
 0x17d   : > { %281 = sst [smem:[#allocation3]] %s367_s24 }
 0x17e PF: > { %p372_p8 = scmp.eq.s32.totalorder %s352_s12, 3  ;;  %s405_s27 = scalar_lea.hbm %s524_s2, 16 }
 0x17f   : > { %p406_p9 = scmp.ne.s32.totalorder %s524_s2, %s405_s27  ;;  %p411_p12 = scmp.lt.u32.totalorder %s405_s27, %s524_s2 }
 0x181   : > { %p407_p10 = pnand %p406_p9, %p372_p8 }
 0x183   : > { %p408_p11 = pneg %p407_p10 }
 0x185   : > { %p413_p13 = pnand %p411_p12, %p408_p11 }
 0x187   : > { %416 = shalt.err (!%p413_p13)
}
 0x188   : > { %s449_s4 = smov [#allocation3]  }
 0x189   : > { %369 = dma.smem_to_hbm (%p372_p8), %s449_s4, 16, %s524_s2, [#allocation4]  }
 0x18a   : > { %430 = dma.done.wait (%p372_p8), [#allocation4], 16  }
 0x18b   : > { %432 = vsyncadd (%p372_p8), [#allocation4], 4294967280 }
 0x18c   : > { %297 = sfence }
 0x18d PF: > { %s13_s11 = sadd.s32 1, %s443_s11   ;;  %s525_s9 = smov %s439_s10 }
 0x18e   : > { %p10_p0 = scmp.ge.s32.totalorder %s13_s11, 6   ;;  %s526_s10 = smov %s528_s13 }
 0x190   :  { %12 = sbr.rel (!%p10_p0) target bundleno = 2 (0x2), region = 68 }
 0x197   :  { %303 = vsyncpa [#allocation4], 1 }
 0x198   :  { %305 = vsyncpa [#allocation4 + $0x1], 1 }

</bundles_post_ra>
